<compile_context>
chip_gen: v5e
topology: v5e:2x2
jax: 0.10.0
libtpu: 0.0.40
codegen_flags: <defaults>
</compile_context>

<pallas_src>
import functools

import jax
import jax.numpy as jnp
from jax.experimental import pallas as pl
from jax.experimental.pallas import tpu as pltpu

BN_EPS = 1e-5


# ----------------------------- Pallas kernel --------------------------------
def _fused_matmul_kernel(x_ref, w_ref, scale_ref, shift_ref, o_ref, *, activation):
    # blocks: x (1, TM, K) bf16, w (1, K, Np) bf16, scale/shift (1, 1, Np) f32,
    #         o (1, TM, Np).  f32 accumulation + f32 epilogue.
    y = jnp.dot(x_ref[0], w_ref[0], preferred_element_type=jnp.float32)
    y = y * scale_ref[0] + shift_ref[0]
    if activation == "leaky_relu":
        y = jnp.where(y >= 0, y, 0.2 * y)          # nn.LeakyReLU(0.2)
    elif activation == "tanh":
        y = jnp.tanh(y)                            # nn.Tanh()
    o_ref[0] = y.astype(o_ref.dtype)


def fused_matmul(x, w, scale, shift, activation, out_dtype=jnp.bfloat16):
    """Batched fused matmul: act((x[g] @ w[g]) * scale[g] + shift[g]).

    x: [G, M, K]   w: [G, K, N]   scale/shift: [G, N]   ->   [G, M, N]
    Internally pads M to a multiple of the row tile and N to a multiple of 128
    (lane-dense stores); the unpadded result is returned.
    """
    G, M, K = x.shape
    _, _, N = w.shape
    o_bytes = jnp.dtype(out_dtype).itemsize

    Np = max(128, ((N + 127) // 128) * 128)          # lane-dense output width
    Mp = ((M + 7) // 8) * 8
    TM = min(512, Mp)                                # row tile

    # keep double-buffered tiles comfortably inside scoped VMEM (v5e/v7x friendly)
    def footprint(tm):
        return 2 * (tm * K * 2 + K * Np * 2 + tm * Np * o_bytes) + 4 * Np * 4
    while TM > 8 and footprint(TM) > 12 * 1024 * 1024:
        TM //= 2
    TM = max(8, (TM // 8) * 8)
    Mp = ((M + TM - 1) // TM) * TM

    xb = jnp.pad(x.astype(jnp.bfloat16), ((0, 0), (0, Mp - M), (0, 0)))
    wb = jnp.pad(w.astype(jnp.bfloat16), ((0, 0), (0, 0), (0, Np - N)))
    sb = jnp.pad(scale.astype(jnp.float32), ((0, 0), (0, Np - N)),
                 constant_values=1.0)[:, None, :]
    hb = jnp.pad(shift.astype(jnp.float32), ((0, 0), (0, Np - N)))[:, None, :]

    kern = functools.partial(_fused_matmul_kernel, activation=activation)
    cost = pl.CostEstimate(
        flops=2 * G * Mp * K * Np,
        transcendentals=G * Mp * Np if activation == "tanh" else 0,
        bytes_accessed=xb.size * 2 + wb.size * 2 + sb.size * 4 + hb.size * 4
                       + G * Mp * Np * o_bytes)

    out = pl.pallas_call(
        kern,
        out_shape=jax.ShapeDtypeStruct((G, Mp, Np), out_dtype),
        grid=(G, Mp // TM),
        in_specs=[
            pl.BlockSpec((1, TM, K), lambda g, i: (g, i, 0)),
            pl.BlockSpec((1, K, Np), lambda g, i: (g, 0, 0)),
            pl.BlockSpec((1, 1, Np), lambda g, i: (g, 0, 0)),
            pl.BlockSpec((1, 1, Np), lambda g, i: (g, 0, 0)),
        ],
        out_specs=pl.BlockSpec((1, TM, Np), lambda g, i: (g, i, 0)),
        compiler_params=pltpu.CompilerParams(
            dimension_semantics=("parallel", "parallel"),
            vmem_limit_bytes=32 * 1024 * 1024),
        cost_estimate=cost,
    )(xb, wb, sb, hb)
    return out[:, :M, :N]


# ------------------------------- JAX glue ------------------------------------
def bn_fold(bn):
    # eval-mode BatchNorm folded into per-channel scale/shift
    scale = bn["gamma"] / jnp.sqrt(bn["var"] + BN_EPS)
    shift = bn["beta"] - bn["mean"] * scale
    return scale, shift


def convT_1x1_block(x_nhwc, w_t, scale, shift, activation, out_dtype):
    # ConvTranspose2d(Cin, Cout, K, stride=1, pad=0) on a 1x1 spatial input:
    #   y[b, ky, kx, co] = sum_ci x[b, ci] * W[ci, co, ky, kx]   (a single matmul)
    B = x_nhwc.shape[0]
    Cin, Cout, K, _ = w_t.shape
    xm = x_nhwc.reshape(B, Cin)
    wm = w_t.transpose(0, 2, 3, 1).reshape(Cin, K * K * Cout)   # cols = (ky, kx, co)
    sc = jnp.tile(scale, K * K)
    sf = jnp.tile(shift, K * K)
    y = fused_matmul(xm[None], wm[None], sc[None], sf[None], activation, out_dtype)[0]
    return y.reshape(B, K, K, Cout)                             # NHWC


# parity -> (padded input row offsets, paired kernel rows) for K=4, stride=2, pad=1
_TAPS = {0: ((1, 0), (1, 3)),
         1: ((2, 1), (0, 2))}


def convT_s2_block(x_nhwc, w_t, scale, shift, activation, out_dtype):
    # ConvTranspose2d(Cin, Cout, 4, stride=2, pad=1) via sub-pixel decomposition:
    # each of the 4 output-parity classes is a dense [B*H*W, 4*Cin] @ [4*Cin, Cout]
    # matmul (no dilation zeros); all 4 run as one batched pallas_call.
    B, H, W, Cin = x_nhwc.shape
    Cout = w_t.shape[1]
    assert w_t.shape[2] == 4 and w_t.shape[3] == 4
    xp = jnp.pad(x_nhwc, ((0, 0), (1, 1), (1, 1), (0, 0)))
    wk = w_t.transpose(2, 3, 0, 1)                       # [ky, kx, Cin, Cout]

    patches, weights = [], []
    for ry in (0, 1):
        oys, krs = _TAPS[ry]
        for rx in (0, 1):
            oxs, kcs = _TAPS[rx]
            taps = [xp[:, oy:oy + H, ox:ox + W, :] for oy in oys for ox in oxs]
            patches.append(jnp.stack(taps, axis=3).reshape(B * H * W, 4 * Cin))
            wsub = jnp.stack([wk[a, b] for a in krs for b in kcs], axis=0)
            weights.append(wsub.reshape(4 * Cin, Cout))

    x4 = jnp.stack(patches, axis=0)                      # [4, B*H*W, 4*Cin]
    w4 = jnp.stack(weights, axis=0)                      # [4, 4*Cin, Cout]
    s4 = jnp.broadcast_to(scale, (4, Cout))
    f4 = jnp.broadcast_to(shift, (4, Cout))
    y4 = fused_matmul(x4, w4, s4, f4, activation, out_dtype)    # [4, B*H*W, Cout]

    y4 = y4.reshape(2, 2, B, H, W, Cout).transpose(2, 3, 0, 4, 1, 5)
    return y4.reshape(B, 2 * H, 2 * W, Cout)             # NHWC, upsampled 2x


def heads_block(x_nhwc, w_mean, b_mean, w_logvar, b_logvar):
    # fuse the two heads: one patch extraction, one tanh matmul, split channels
    Cout = w_mean.shape[1]
    w_cat = jnp.concatenate([w_mean, w_logvar], axis=1)  # [Cin, 2*Cout, 4, 4]
    b_cat = jnp.concatenate([b_mean, b_logvar], axis=0)
    ones = jnp.ones_like(b_cat)
    y = convT_s2_block(x_nhwc, w_cat, ones, b_cat, "tanh", jnp.float32)
    return y[..., :Cout], y[..., Cout:]


def decoder_forward(params, z):
    B = z.shape[0]
    # fc: Linear + BatchNorm1d (eval) + LeakyReLU, fused in one kernel call
    s, sh = bn_fold(params["fc_bn"])
    x = fused_matmul(z[None], params["fc_w"].T[None], s[None],
                     (params["fc_b"] * s + sh)[None], "leaky_relu")[0]
    d = x.shape[1]
    x = x.reshape(B, 1, 1, d)                            # NHWC, 1x1 spatial

    layers = params["model"]
    # first layer: ConvTranspose2d(d, d, 4, 1, 0) on the 1x1 input -> pure matmul
    s, sh = bn_fold(layers[0]["bn"])
    x = convT_1x1_block(x, layers[0]["w"], s, sh, "leaky_relu", jnp.bfloat16)
    # upsampling stack: ConvTranspose2d(c, c//2, 4, 2, 1) + BN + LeakyReLU
    for layer in layers[1:]:
        s, sh = bn_fold(layer["bn"])
        x = convT_s2_block(x, layer["w"], s, sh, "leaky_relu", jnp.bfloat16)

    mu, logvar = heads_block(x, params["mean"]["w"], params["mean"]["b"],
                             params["logvar"]["w"], params["logvar"]["b"])
    mu = mu.transpose(0, 3, 1, 2)                        # NCHW at the boundary
    logvar = logvar.transpose(0, 3, 1, 2)
    # TODO(synk): training-mode path (eps * exp(0.5*logvar) sampling and
    # batch-statistic BatchNorm) not implemented; eval-mode forward returns mu.
    return mu, mu, logvar


# ------------------------- pure-JAX f32 reference -----------------------------
def _ref_convT(x_nchw, w_t, stride, pad, bias=None):
    # ConvTranspose2d == regular conv over the stride-dilated, (K-1-pad)-padded
    # input with the flipped / transposed kernel.
    K = w_t.shape[-1]
    w_conv = jnp.flip(w_t, (2, 3)).transpose(1, 0, 2, 3)
    y = jax.lax.conv_general_dilated(
        x_nchw, w_conv, window_strides=(1, 1),
        padding=[(K - 1 - pad, K - 1 - pad)] * 2,
        lhs_dilation=(stride, stride),
        dimension_numbers=("NCHW", "OIHW", "NCHW"))
    if bias is not None:
        y = y + bias.reshape(1, -1, 1, 1)
    return y


def _leaky(x):
    return jnp.where(x >= 0, x, 0.2 * x)


def decoder_reference(params, z):
    s, sh = bn_fold(params["fc_bn"])
    x = _leaky((z @ params["fc_w"].T + params["fc_b"]) * s + sh)
    x = x.reshape(x.shape[0], x.shape[1], 1, 1)
    for layer in params["model"]:
        s, sh = bn_fold(layer["bn"])
        y = _ref_convT(x, layer["w"], layer["stride"], layer["pad"])
        x = _leaky(y * s.reshape(1, -1, 1, 1) + sh.reshape(1, -1, 1, 1))
    mu = jnp.tanh(_ref_convT(x, params["mean"]["w"], 2, 1, params["mean"]["b"]))
    logvar = jnp.tanh(_ref_convT(x, params["logvar"]["w"], 2, 1, params["logvar"]["b"]))
    return mu, mu, logvar


# ----------------------------- parameter init --------------------------------
def init_params(key, *, target_size=16, target_channels=3, step_channels=8, z_dim=8):
    from math import ceil, log2
    assert target_size >= 16 and ceil(log2(target_size)) == log2(target_size)
    step_up = target_size.bit_length() - 4
    d = step_channels * 2 ** step_up
    keys = iter(jax.random.split(key, 32))

    def rnd(shape):
        return 0.1 * jax.random.normal(next(keys), shape, dtype=jnp.float32)

    def bn(c):
        return dict(gamma=jnp.ones((c,), jnp.float32), beta=jnp.zeros((c,), jnp.float32),
                    mean=jnp.zeros((c,), jnp.float32), var=jnp.ones((c,), jnp.float32))

    params = {
        "fc_w": rnd((d, z_dim)),       # nn.Linear(z_dim, d) weight [d, z_dim]
        "fc_b": rnd((d,)),
        "fc_bn": bn(d),
        "model": [],
    }
    # ConvTranspose2d(d, d, 4, 1, 0, bias=False) + BN + LeakyReLU
    params["model"].append(dict(w=rnd((d, d, 4, 4)), bn=bn(d), stride=1, pad=0))
    for _ in range(step_up):
        params["model"].append(dict(w=rnd((d, d // 2, 4, 4)), bn=bn(d // 2),
                                    stride=2, pad=1))
        d = d // 2
    params["mean"] = dict(w=rnd((d, target_channels, 4, 4)), b=rnd((target_channels,)))
    params["logvar"] = dict(w=rnd((d, target_channels, 4, 4)), b=rnd((target_channels,)))
    return params


if __name__ == "__main__":
    key = jax.random.PRNGKey(0)
    pkey, zkey = jax.random.split(key)
    # small shapes: target_size=16, target_channels=3, step_channels=8, z_dim=8, batch=2
    params = init_params(pkey, target_size=16, target_channels=3,
                         step_channels=8, z_dim=8)
    z = jax.random.normal(zkey, (2, 8), dtype=jnp.float32)

    out, mu, logvar = jax.jit(decoder_forward)(params, z)
    jax.block_until_ready((out, mu, logvar))

    assert out.shape == (2, 3, 16, 16)
    assert mu.shape == (2, 3, 16, 16)
    assert logvar.shape == (2, 3, 16, 16)
    assert bool(jnp.all(jnp.isfinite(mu))) and bool(jnp.all(jnp.isfinite(logvar)))

    # numeric check against the pure-JAX f32 reference (loose tol: bf16 MXU operands)
    _, r_mu, r_logvar = decoder_reference(params, z)
    assert float(jnp.max(jnp.abs(mu - r_mu))) < 5e-2
    assert float(jnp.max(jnp.abs(logvar - r_logvar))) < 5e-2

    print("KERNEL_OK")
</pallas_src>

<mosaic_0001>
module attributes {stable_mosaic.version = 11 : i64} {
  func.func @_fused_matmul_kernel(%arg0: i32, %arg1: i32, %arg2: memref<1x8x8xbf16, #tpu.memory_space<vmem>>, %arg3: memref<1x8x128xbf16, #tpu.memory_space<vmem>>, %arg4: memref<1x1x128xf32, #tpu.memory_space<vmem>>, %arg5: memref<1x1x128xf32, #tpu.memory_space<vmem>>, %arg6: memref<1x8x128xbf16, #tpu.memory_space<vmem>>) attributes {dimension_semantics = [#tpu.dimension_semantics<parallel>, #tpu.dimension_semantics<parallel>], iteration_bounds = array<i64: 1, 1>, scalar_prefetch = 0 : i64, scratch_operands = 0 : i64, tpu.core_type = #tpu.core_type<tc>, window_params = [{transform_indices = @transform_0, window_bounds = array<i64: 1, 8, 8>}, {transform_indices = @transform_1, window_bounds = array<i64: 1, 8, 128>}, {transform_indices = @transform_2, window_bounds = array<i64: 1, 1, 128>}, {transform_indices = @transform_3, window_bounds = array<i64: 1, 1, 128>}, {transform_indices = @transform_4, window_bounds = array<i64: 1, 8, 128>}]} {
    %c0 = arith.constant 0 : index
    %c0_0 = arith.constant 0 : index
    %c0_1 = arith.constant 0 : index
    %0 = vector.load %arg2[%c0, %c0_0, %c0_1] : memref<1x8x8xbf16, #tpu.memory_space<vmem>>, vector<1x8x8xbf16>
    %1 = vector.shape_cast %0 : vector<1x8x8xbf16> to vector<8x8xbf16>
    %c0_2 = arith.constant 0 : index
    %c0_3 = arith.constant 0 : index
    %c0_4 = arith.constant 0 : index
    %2 = vector.load %arg3[%c0_2, %c0_3, %c0_4] : memref<1x8x128xbf16, #tpu.memory_space<vmem>>, vector<1x8x128xbf16>
    %3 = vector.shape_cast %2 : vector<1x8x128xbf16> to vector<8x128xbf16>
    %cst = arith.constant dense<0.000000e+00> : vector<8x128xf32>
    %4 = tpu.matmul %1, %3, %cst {dimension_numbers = #tpu.dot_dimension_numbers<[1], [0], [0], [1], [0, 0, 1, 1], [], []>} : vector<8x8xbf16>, vector<8x128xbf16>, vector<8x128xf32> -> vector<8x128xf32>
    %c0_5 = arith.constant 0 : index
    %c0_6 = arith.constant 0 : index
    %c0_7 = arith.constant 0 : index
    %5 = vector.load %arg4[%c0_5, %c0_6, %c0_7] : memref<1x1x128xf32, #tpu.memory_space<vmem>>, vector<1x1x128xf32>
    %6 = vector.shape_cast %5 : vector<1x1x128xf32> to vector<1x128xf32>
    %7 = vector.broadcast %6 : vector<1x128xf32> to vector<8x128xf32>
    %8 = arith.mulf %4, %7 : vector<8x128xf32>
    %c0_8 = arith.constant 0 : index
    %c0_9 = arith.constant 0 : index
    %c0_10 = arith.constant 0 : index
    %9 = vector.load %arg5[%c0_8, %c0_9, %c0_10] : memref<1x1x128xf32, #tpu.memory_space<vmem>>, vector<1x1x128xf32>
    %10 = vector.shape_cast %9 : vector<1x1x128xf32> to vector<1x128xf32>
    %11 = vector.broadcast %10 : vector<1x128xf32> to vector<8x128xf32>
    %12 = arith.addf %8, %11 : vector<8x128xf32>
    %cst_11 = arith.constant 0.000000e+00 : f32
    %13 = vector.broadcast %cst_11 : f32 to vector<8x128xf32>
    %14 = arith.cmpf oge, %12, %13 : vector<8x128xf32>
    %cst_12 = arith.constant 2.000000e-01 : f32
    %15 = vector.broadcast %cst_12 : f32 to vector<8x128xf32>
    %16 = arith.mulf %15, %12 : vector<8x128xf32>
    %17 = arith.select %14, %12, %16 : vector<8x128xi1>, vector<8x128xf32>
    %18 = arith.truncf %17 : vector<8x128xf32> to vector<8x128xbf16>
    %c0_13 = arith.constant 0 : index
    %c0_14 = arith.constant 0 : index
    %c0_15 = arith.constant 0 : index
    %19 = vector.load %arg6[%c0_13, %c0_14, %c0_15] : memref<1x8x128xbf16, #tpu.memory_space<vmem>>, vector<1x8x128xbf16>
    %20 = vector.shape_cast %19 : vector<1x8x128xbf16> to vector<8x128xbf16>
    %21 = vector.shape_cast %18 : vector<8x128xbf16> to vector<1x8x128xbf16>
    tpu.vector_store %arg6[%c0_13, %c0_14, %c0_15], %21 {strides = array<i32>} : memref<1x8x128xbf16, #tpu.memory_space<vmem>>, vector<1x8x128xbf16>,
    return
  }
  func.func @transform_0(%arg0: i32, %arg1: i32) -> (i32, i32, i32) {
    %c0_i32 = arith.constant 0 : i32
    %c0_i32_0 = arith.constant 0 : i32
    return %arg0, %arg1, %c0_i32 : i32, i32, i32
  }
  func.func @transform_1(%arg0: i32, %arg1: i32) -> (i32, i32, i32) {
    %c0_i32 = arith.constant 0 : i32
    %c0_i32_0 = arith.constant 0 : i32
    %c0_i32_1 = arith.constant 0 : i32
    return %arg0, %c0_i32, %c0_i32_0 : i32, i32, i32
  }
  func.func @transform_2(%arg0: i32, %arg1: i32) -> (i32, i32, i32) {
    %c0_i32 = arith.constant 0 : i32
    %c0_i32_0 = arith.constant 0 : i32
    %c0_i32_1 = arith.constant 0 : i32
    return %arg0, %c0_i32, %c0_i32_0 : i32, i32, i32
  }
  func.func @transform_3(%arg0: i32, %arg1: i32) -> (i32, i32, i32) {
    %c0_i32 = arith.constant 0 : i32
    %c0_i32_0 = arith.constant 0 : i32
    %c0_i32_1 = arith.constant 0 : i32
    return %arg0, %c0_i32, %c0_i32_0 : i32, i32, i32
  }
  func.func @transform_4(%arg0: i32, %arg1: i32) -> (i32, i32, i32) {
    %c0_i32 = arith.constant 0 : i32
    %c0_i32_0 = arith.constant 0 : i32
    return %arg0, %arg1, %c0_i32 : i32, i32, i32
  }
}

module attributes {stable_mosaic.version = 11 : i64} {
  func.func @_fused_matmul_kernel(%arg0: i32, %arg1: i32, %arg2: memref<1x8x16xbf16, #tpu.memory_space<vmem>>, %arg3: memref<1x16x256xbf16, #tpu.memory_space<vmem>>, %arg4: memref<1x1x256xf32, #tpu.memory_space<vmem>>, %arg5: memref<1x1x256xf32, #tpu.memory_space<vmem>>, %arg6: memref<1x8x256xbf16, #tpu.memory_space<vmem>>) attributes {dimension_semantics = [#tpu.dimension_semantics<parallel>, #tpu.dimension_semantics<parallel>], iteration_bounds = array<i64: 1, 1>, scalar_prefetch = 0 : i64, scratch_operands = 0 : i64, tpu.core_type = #tpu.core_type<tc>, window_params = [{transform_indices = @transform_0, window_bounds = array<i64: 1, 8, 16>}, {transform_indices = @transform_1, window_bounds = array<i64: 1, 16, 256>}, {transform_indices = @transform_2, window_bounds = array<i64: 1, 1, 256>}, {transform_indices = @transform_3, window_bounds = array<i64: 1, 1, 256>}, {transform_indices = @transform_4, window_bounds = array<i64: 1, 8, 256>}]} {
    %c0 = arith.constant 0 : index
    %c0_0 = arith.constant 0 : index
    %c0_1 = arith.constant 0 : index
    %0 = vector.load %arg2[%c0, %c0_0, %c0_1] : memref<1x8x16xbf16, #tpu.memory_space<vmem>>, vector<1x8x16xbf16>
    %1 = vector.shape_cast %0 : vector<1x8x16xbf16> to vector<8x16xbf16>
    %c0_2 = arith.constant 0 : index
    %c0_3 = arith.constant 0 : index
    %c0_4 = arith.constant 0 : index
    %2 = vector.load %arg3[%c0_2, %c0_3, %c0_4] : memref<1x16x256xbf16, #tpu.memory_space<vmem>>, vector<1x16x256xbf16>
    %3 = vector.shape_cast %2 : vector<1x16x256xbf16> to vector<16x256xbf16>
    %cst = arith.constant dense<0.000000e+00> : vector<8x256xf32>
    %4 = tpu.matmul %1, %3, %cst {dimension_numbers = #tpu.dot_dimension_numbers<[1], [0], [0], [1], [0, 0, 1, 1], [], []>} : vector<8x16xbf16>, vector<16x256xbf16>, vector<8x256xf32> -> vector<8x256xf32>
    %c0_5 = arith.constant 0 : index
    %c0_6 = arith.constant 0 : index
    %c0_7 = arith.constant 0 : index
    %5 = vector.load %arg4[%c0_5, %c0_6, %c0_7] : memref<1x1x256xf32, #tpu.memory_space<vmem>>, vector<1x1x256xf32>
    %6 = vector.shape_cast %5 : vector<1x1x256xf32> to vector<1x256xf32>
    %7 = vector.broadcast %6 : vector<1x256xf32> to vector<8x256xf32>
    %8 = arith.mulf %4, %7 : vector<8x256xf32>
    %c0_8 = arith.constant 0 : index
    %c0_9 = arith.constant 0 : index
    %c0_10 = arith.constant 0 : index
    %9 = vector.load %arg5[%c0_8, %c0_9, %c0_10] : memref<1x1x256xf32, #tpu.memory_space<vmem>>, vector<1x1x256xf32>
    %10 = vector.shape_cast %9 : vector<1x1x256xf32> to vector<1x256xf32>
    %11 = vector.broadcast %10 : vector<1x256xf32> to vector<8x256xf32>
    %12 = arith.addf %8, %11 : vector<8x256xf32>
    %cst_11 = arith.constant 0.000000e+00 : f32
    %13 = vector.broadcast %cst_11 : f32 to vector<8x256xf32>
    %14 = arith.cmpf oge, %12, %13 : vector<8x256xf32>
    %cst_12 = arith.constant 2.000000e-01 : f32
    %15 = vector.broadcast %cst_12 : f32 to vector<8x256xf32>
    %16 = arith.mulf %15, %12 : vector<8x256xf32>
    %17 = arith.select %14, %12, %16 : vector<8x256xi1>, vector<8x256xf32>
    %18 = arith.truncf %17 : vector<8x256xf32> to vector<8x256xbf16>
    %c0_13 = arith.constant 0 : index
    %c0_14 = arith.constant 0 : index
    %c0_15 = arith.constant 0 : index
    %19 = vector.load %arg6[%c0_13, %c0_14, %c0_15] : memref<1x8x256xbf16, #tpu.memory_space<vmem>>, vector<1x8x256xbf16>
    %20 = vector.shape_cast %19 : vector<1x8x256xbf16> to vector<8x256xbf16>
    %21 = vector.shape_cast %18 : vector<8x256xbf16> to vector<1x8x256xbf16>
    tpu.vector_store %arg6[%c0_13, %c0_14, %c0_15], %21 {strides = array<i32>} : memref<1x8x256xbf16, #tpu.memory_space<vmem>>, vector<1x8x256xbf16>,
    return
  }
  func.func @transform_0(%arg0: i32, %arg1: i32) -> (i32, i32, i32) {
    %c0_i32 = arith.constant 0 : i32
    %c0_i32_0 = arith.constant 0 : i32
    return %arg0, %arg1, %c0_i32 : i32, i32, i32
  }
  func.func @transform_1(%arg0: i32, %arg1: i32) -> (i32, i32, i32) {
    %c0_i32 = arith.constant 0 : i32
    %c0_i32_0 = arith.constant 0 : i32
    %c0_i32_1 = arith.constant 0 : i32
    return %arg0, %c0_i32, %c0_i32_0 : i32, i32, i32
  }
  func.func @transform_2(%arg0: i32, %arg1: i32) -> (i32, i32, i32) {
    %c0_i32 = arith.constant 0 : i32
    %c0_i32_0 = arith.constant 0 : i32
    %c0_i32_1 = arith.constant 0 : i32
    return %arg0, %c0_i32, %c0_i32_0 : i32, i32, i32
  }
  func.func @transform_3(%arg0: i32, %arg1: i32) -> (i32, i32, i32) {
    %c0_i32 = arith.constant 0 : i32
    %c0_i32_0 = arith.constant 0 : i32
    %c0_i32_1 = arith.constant 0 : i32
    return %arg0, %c0_i32, %c0_i32_0 : i32, i32, i32
  }
  func.func @transform_4(%arg0: i32, %arg1: i32) -> (i32, i32, i32) {
    %c0_i32 = arith.constant 0 : i32
    %c0_i32_0 = arith.constant 0 : i32
    return %arg0, %arg1, %c0_i32 : i32, i32, i32
  }
}

module attributes {stable_mosaic.version = 11 : i64} {
  func.func @_fused_matmul_kernel(%arg0: i32, %arg1: i32, %arg2: memref<1x32x64xbf16, #tpu.memory_space<vmem>>, %arg3: memref<1x64x128xbf16, #tpu.memory_space<vmem>>, %arg4: memref<1x1x128xf32, #tpu.memory_space<vmem>>, %arg5: memref<1x1x128xf32, #tpu.memory_space<vmem>>, %arg6: memref<1x32x128xbf16, #tpu.memory_space<vmem>>) attributes {dimension_semantics = [#tpu.dimension_semantics<parallel>, #tpu.dimension_semantics<parallel>], iteration_bounds = array<i64: 4, 1>, scalar_prefetch = 0 : i64, scratch_operands = 0 : i64, tpu.core_type = #tpu.core_type<tc>, window_params = [{transform_indices = @transform_0, window_bounds = array<i64: 1, 32, 64>}, {transform_indices = @transform_1, window_bounds = array<i64: 1, 64, 128>}, {transform_indices = @transform_2, window_bounds = array<i64: 1, 1, 128>}, {transform_indices = @transform_3, window_bounds = array<i64: 1, 1, 128>}, {transform_indices = @transform_4, window_bounds = array<i64: 1, 32, 128>}]} {
    %c0 = arith.constant 0 : index
    %c0_0 = arith.constant 0 : index
    %c0_1 = arith.constant 0 : index
    %0 = vector.load %arg2[%c0, %c0_0, %c0_1] : memref<1x32x64xbf16, #tpu.memory_space<vmem>>, vector<1x32x64xbf16>
    %1 = vector.shape_cast %0 : vector<1x32x64xbf16> to vector<32x64xbf16>
    %c0_2 = arith.constant 0 : index
    %c0_3 = arith.constant 0 : index
    %c0_4 = arith.constant 0 : index
    %2 = vector.load %arg3[%c0_2, %c0_3, %c0_4] : memref<1x64x128xbf16, #tpu.memory_space<vmem>>, vector<1x64x128xbf16>
    %3 = vector.shape_cast %2 : vector<1x64x128xbf16> to vector<64x128xbf16>
    %cst = arith.constant dense<0.000000e+00> : vector<32x128xf32>
    %4 = tpu.matmul %1, %3, %cst {dimension_numbers = #tpu.dot_dimension_numbers<[1], [0], [0], [1], [0, 0, 1, 1], [], []>} : vector<32x64xbf16>, vector<64x128xbf16>, vector<32x128xf32> -> vector<32x128xf32>
    %c0_5 = arith.constant 0 : index
    %c0_6 = arith.constant 0 : index
    %c0_7 = arith.constant 0 : index
    %5 = vector.load %arg4[%c0_5, %c0_6, %c0_7] : memref<1x1x128xf32, #tpu.memory_space<vmem>>, vector<1x1x128xf32>
    %6 = vector.shape_cast %5 : vector<1x1x128xf32> to vector<1x128xf32>
    %7 = vector.broadcast %6 : vector<1x128xf32> to vector<32x128xf32>
    %8 = arith.mulf %4, %7 : vector<32x128xf32>
    %c0_8 = arith.constant 0 : index
    %c0_9 = arith.constant 0 : index
    %c0_10 = arith.constant 0 : index
    %9 = vector.load %arg5[%c0_8, %c0_9, %c0_10] : memref<1x1x128xf32, #tpu.memory_space<vmem>>, vector<1x1x128xf32>
    %10 = vector.shape_cast %9 : vector<1x1x128xf32> to vector<1x128xf32>
    %11 = vector.broadcast %10 : vector<1x128xf32> to vector<32x128xf32>
    %12 = arith.addf %8, %11 : vector<32x128xf32>
    %cst_11 = arith.constant 0.000000e+00 : f32
    %13 = vector.broadcast %cst_11 : f32 to vector<32x128xf32>
    %14 = arith.cmpf oge, %12, %13 : vector<32x128xf32>
    %cst_12 = arith.constant 2.000000e-01 : f32
    %15 = vector.broadcast %cst_12 : f32 to vector<32x128xf32>
    %16 = arith.mulf %15, %12 : vector<32x128xf32>
    %17 = arith.select %14, %12, %16 : vector<32x128xi1>, vector<32x128xf32>
    %18 = arith.truncf %17 : vector<32x128xf32> to vector<32x128xbf16>
    %c0_13 = arith.constant 0 : index
    %c0_14 = arith.constant 0 : index
    %c0_15 = arith.constant 0 : index
    %19 = vector.load %arg6[%c0_13, %c0_14, %c0_15] : memref<1x32x128xbf16, #tpu.memory_space<vmem>>, vector<1x32x128xbf16>
    %20 = vector.shape_cast %19 : vector<1x32x128xbf16> to vector<32x128xbf16>
    %21 = vector.shape_cast %18 : vector<32x128xbf16> to vector<1x32x128xbf16>
    tpu.vector_store %arg6[%c0_13, %c0_14, %c0_15], %21 {strides = array<i32>} : memref<1x32x128xbf16, #tpu.memory_space<vmem>>, vector<1x32x128xbf16>,
    return
  }
  func.func @transform_0(%arg0: i32, %arg1: i32) -> (i32, i32, i32) {
    %c0_i32 = arith.constant 0 : i32
    %c0_i32_0 = arith.constant 0 : i32
    return %arg0, %arg1, %c0_i32 : i32, i32, i32
  }
  func.func @transform_1(%arg0: i32, %arg1: i32) -> (i32, i32, i32) {
    %c0_i32 = arith.constant 0 : i32
    %c0_i32_0 = arith.constant 0 : i32
    %c0_i32_1 = arith.constant 0 : i32
    return %arg0, %c0_i32, %c0_i32_0 : i32, i32, i32
  }
  func.func @transform_2(%arg0: i32, %arg1: i32) -> (i32, i32, i32) {
    %c0_i32 = arith.constant 0 : i32
    %c0_i32_0 = arith.constant 0 : i32
    %c0_i32_1 = arith.constant 0 : i32
    return %arg0, %c0_i32, %c0_i32_0 : i32, i32, i32
  }
  func.func @transform_3(%arg0: i32, %arg1: i32) -> (i32, i32, i32) {
    %c0_i32 = arith.constant 0 : i32
    %c0_i32_0 = arith.constant 0 : i32
    %c0_i32_1 = arith.constant 0 : i32
    return %arg0, %c0_i32, %c0_i32_0 : i32, i32, i32
  }
  func.func @transform_4(%arg0: i32, %arg1: i32) -> (i32, i32, i32) {
    %c0_i32 = arith.constant 0 : i32
    %c0_i32_0 = arith.constant 0 : i32
    return %arg0, %arg1, %c0_i32 : i32, i32, i32
  }
}

module attributes {stable_mosaic.version = 11 : i64} {
  func.func @_fused_matmul_kernel(%arg0: i32, %arg1: i32, %arg2: memref<1x128x32xbf16, #tpu.memory_space<vmem>>, %arg3: memref<1x32x128xbf16, #tpu.memory_space<vmem>>, %arg4: memref<1x1x128xf32, #tpu.memory_space<vmem>>, %arg5: memref<1x1x128xf32, #tpu.memory_space<vmem>>, %arg6: memref<1x128x128xf32, #tpu.memory_space<vmem>>) attributes {dimension_semantics = [#tpu.dimension_semantics<parallel>, #tpu.dimension_semantics<parallel>], iteration_bounds = array<i64: 4, 1>, scalar_prefetch = 0 : i64, scratch_operands = 0 : i64, tpu.core_type = #tpu.core_type<tc>, window_params = [{transform_indices = @transform_0, window_bounds = array<i64: 1, 128, 32>}, {transform_indices = @transform_1, window_bounds = array<i64: 1, 32, 128>}, {transform_indices = @transform_2, window_bounds = array<i64: 1, 1, 128>}, {transform_indices = @transform_3, window_bounds = array<i64: 1, 1, 128>}, {transform_indices = @transform_4, window_bounds = array<i64: 1, 128, 128>}]} {
    %c0 = arith.constant 0 : index
    %c0_0 = arith.constant 0 : index
    %c0_1 = arith.constant 0 : index
    %0 = vector.load %arg2[%c0, %c0_0, %c0_1] : memref<1x128x32xbf16, #tpu.memory_space<vmem>>, vector<1x128x32xbf16>
    %1 = vector.shape_cast %0 : vector<1x128x32xbf16> to vector<128x32xbf16>
    %c0_2 = arith.constant 0 : index
    %c0_3 = arith.constant 0 : index
    %c0_4 = arith.constant 0 : index
    %2 = vector.load %arg3[%c0_2, %c0_3, %c0_4] : memref<1x32x128xbf16, #tpu.memory_space<vmem>>, vector<1x32x128xbf16>
    %3 = vector.shape_cast %2 : vector<1x32x128xbf16> to vector<32x128xbf16>
    %cst = arith.constant dense<0.000000e+00> : vector<128x128xf32>
    %4 = tpu.matmul %1, %3, %cst {dimension_numbers = #tpu.dot_dimension_numbers<[1], [0], [0], [1], [0, 0, 1, 1], [], []>} : vector<128x32xbf16>, vector<32x128xbf16>, vector<128x128xf32> -> vector<128x128xf32>
    %c0_5 = arith.constant 0 : index
    %c0_6 = arith.constant 0 : index
    %c0_7 = arith.constant 0 : index
    %5 = vector.load %arg4[%c0_5, %c0_6, %c0_7] : memref<1x1x128xf32, #tpu.memory_space<vmem>>, vector<1x1x128xf32>
    %6 = vector.shape_cast %5 : vector<1x1x128xf32> to vector<1x128xf32>
    %7 = vector.broadcast %6 : vector<1x128xf32> to vector<128x128xf32>
    %8 = arith.mulf %4, %7 : vector<128x128xf32>
    %c0_8 = arith.constant 0 : index
    %c0_9 = arith.constant 0 : index
    %c0_10 = arith.constant 0 : index
    %9 = vector.load %arg5[%c0_8, %c0_9, %c0_10] : memref<1x1x128xf32, #tpu.memory_space<vmem>>, vector<1x1x128xf32>
    %10 = vector.shape_cast %9 : vector<1x1x128xf32> to vector<1x128xf32>
    %11 = vector.broadcast %10 : vector<1x128xf32> to vector<128x128xf32>
    %12 = arith.addf %8, %11 : vector<128x128xf32>
    %13 = math.tanh %12 : vector<128x128xf32>
    %c0_11 = arith.constant 0 : index
    %c0_12 = arith.constant 0 : index
    %c0_13 = arith.constant 0 : index
    %14 = vector.load %arg6[%c0_11, %c0_12, %c0_13] : memref<1x128x128xf32, #tpu.memory_space<vmem>>, vector<1x128x128xf32>
    %15 = vector.shape_cast %14 : vector<1x128x128xf32> to vector<128x128xf32>
    %16 = vector.shape_cast %13 : vector<128x128xf32> to vector<1x128x128xf32>
    tpu.vector_store %arg6[%c0_11, %c0_12, %c0_13], %16 {strides = array<i32>} : memref<1x128x128xf32, #tpu.memory_space<vmem>>, vector<1x128x128xf32>,
    return
  }
  func.func @transform_0(%arg0: i32, %arg1: i32) -> (i32, i32, i32) {
    %c0_i32 = arith.constant 0 : i32
    %c0_i32_0 = arith.constant 0 : i32
    return %arg0, %arg1, %c0_i32 : i32, i32, i32
  }
  func.func @transform_1(%arg0: i32, %arg1: i32) -> (i32, i32, i32) {
    %c0_i32 = arith.constant 0 : i32
    %c0_i32_0 = arith.constant 0 : i32
    %c0_i32_1 = arith.constant 0 : i32
    return %arg0, %c0_i32, %c0_i32_0 : i32, i32, i32
  }
  func.func @transform_2(%arg0: i32, %arg1: i32) -> (i32, i32, i32) {
    %c0_i32 = arith.constant 0 : i32
    %c0_i32_0 = arith.constant 0 : i32
    %c0_i32_1 = arith.constant 0 : i32
    return %arg0, %c0_i32, %c0_i32_0 : i32, i32, i32
  }
  func.func @transform_3(%arg0: i32, %arg1: i32) -> (i32, i32, i32) {
    %c0_i32 = arith.constant 0 : i32
    %c0_i32_0 = arith.constant 0 : i32
    %c0_i32_1 = arith.constant 0 : i32
    return %arg0, %c0_i32, %c0_i32_0 : i32, i32, i32
  }
  func.func @transform_4(%arg0: i32, %arg1: i32) -> (i32, i32, i32) {
    %c0_i32 = arith.constant 0 : i32
    %c0_i32_0 = arith.constant 0 : i32
    return %arg0, %arg1, %c0_i32 : i32, i32, i32
  }
}

</mosaic_0001>

<bundles_post_ra>
// kernel: tile.13
= control target key start
LH: loop header
LB: loop body
LE: loop exit
PB: predicated region body
PF: predicated region fallthrough
CT: control target
= control target key end

     0   :  { %s28_s0 = inlined_call_operand.vmem [shape: f32[16], index: 0, kind: input, shape index: {}]   ;;  %s29_s1 = inlined_call_operand.vmem [shape: f32[16,16], index: 1, kind: output, shape index: {}]  }
   0x1   :  { %v4_v0 = vld [vmem:[%s28_s0] ss:$0 sm:$0xff] }
   0x2   :  { %5 = vst [vmem:[%s29_s1] sm:$0xff] %v4_v0 }
   0x3   :  { %8 = vst [vmem:[%s29_s1 + $0x8] sm:$0xff] %v4_v0 }

// kernel: squeeze.33
= control target key start
LH: loop header
LB: loop body
LE: loop exit
PB: predicated region body
PF: predicated region fallthrough
CT: control target
= control target key end

     0   :  { %vm33_vm0 = vcmask 130048   ;;  %s172_s10 = smov 80   ;;  %s173_s11 = smov 48   ;;  %s236_s0 = inlined_call_operand.vmem [shape: bf16[1,2,256], index: 0, kind: input, shape index: {}]   ;;  %s237_s1 = inlined_call_operand.vmem [shape: bf16[2,4,4,16], index: 1, kind: output, shape index: {}]  }
   0x1   :  { %v156_v0 = vld [vmem:[%s236_s0 + $0x1] sm:$0x1]  ;;  %v28_v1 = vld [vmem:[%s236_s0] sm:$0x1]  ;;  %s171_s0 = smov 112   ;;  %s174_s12 = smov 96  }
   0x2   :  { %v15_v2 = vunpack.c.l.bf16 %v156_v0  ;;  %v29_v3 = vunpack.c.l.bf16 %v28_v1  ;;  %s175_s13 = smov 64   ;;  %s176_s14 = smov 32  }
   0x3   :  { %s177_s15 = smov 16  }
   0x4   :  { %18 = vst [vmem:[#allocation1 + $0x8] sm:$0x3] %v15_v2 }
   0x5   :  { %31 = vst [vmem:[#allocation1] sm:$0x3] %v29_v3 }
   0xb   :  { %v38_v6 = vld [vmem:[#allocation1 + $0x8] sm:$0x3]  }
   0xc   :  { %v44_v4 = vld.sshfl [vmem:[#allocation1] sm:$0xff pattern:$0x99999180]   ;;  %41 = vst.msk [vmem:[#allocation0 + $0x10] sm:$0x1] %vm33_vm0, %v38_v6  }
   0xd   :  { %v32_v5 = vld [vmem:[#allocation1] sm:$0x3]   ;;  %45 = vrot.lane.b32.xlu0 %v44_v4, %s171_s0  ;;  %61 = vrot.lane.b32.xlu1 %v44_v4, %s172_s10  ;;  %43 = vst.msk [vmem:[#allocation0 + $0x2f] sm:$0x2] %vm33_vm0, %v38_v6  }
   0xe   :  { %34 = vst.msk [vmem:[#allocation0] sm:$0x1] %vm33_vm0, %v32_v5   ;;  %77 = vrot.lane.b32.xlu2 %v44_v4, %s173_s11 }
   0xf   :  { %36 = vst.msk [vmem:[#allocation0 + $0x1f] sm:$0x2] %vm33_vm0, %v32_v5  }
  0x15   :  { %53 = vrot.lane.b32.xlu0 %v44_v4, %s174_s12  ;;  %69 = vrot.lane.b32.xlu1 %v44_v4, %s175_s13 }
  0x16   :  { %85 = vrot.lane.b32.xlu2 %v44_v4, %s176_s14 }
  0x1d   :  { %93 = vrot.lane.b32.xlu0 %v44_v4, %s177_s15 }
  0x68   :  { %v78_v7 = vpop.permute.xlu2 %77  }
  0x69   :  { %81 = vst.msk [vmem:[#allocation0 + $0x9] ss:$16 sm:$0x3] %vm33_vm0, %v78_v7  }
  0x6a   :  { %83 = vst.msk [vmem:[#allocation0 + $0x9] ss:$16 sm:$0xc] %vm33_vm0, %v78_v7  }
  0x70   :  { %v86_v8 = vpop.permute.xlu2 %85  }
  0x71   :  { %89 = vst.msk [vmem:[#allocation0 + $0xa] ss:$16 sm:$0x3] %vm33_vm0, %v86_v8  }
  0x72   :  { %91 = vst.msk [vmem:[#allocation0 + $0xa] ss:$16 sm:$0xc] %vm33_vm0, %v86_v8  }
  0x7f   :  { %v46_v9 = vpop.permute.xlu0 %45   ;;  %v62_v10 = vpop.permute.xlu1 %61  }
  0x80   :  { %49 = vst.msk [vmem:[#allocation0 + $0x1] ss:$16 sm:$0x3] %vm33_vm0, %v46_v9  }
  0x81   :  { %51 = vst.msk [vmem:[#allocation0 + $0x1] ss:$16 sm:$0xc] %vm33_vm0, %v46_v9  }
  0x82   :  { %65 = vst.msk [vmem:[#allocation0 + $0x3] ss:$16 sm:$0x3] %vm33_vm0, %v62_v10  }
  0x83   :  { %67 = vst.msk [vmem:[#allocation0 + $0x3] ss:$16 sm:$0xc] %vm33_vm0, %v62_v10  }
  0x87   :  { %v54_v11 = vpop.permute.xlu0 %53   ;;  %v70_v12 = vpop.permute.xlu1 %69  }
  0x88   :  { %57 = vst.msk [vmem:[#allocation0 + $0x2] ss:$16 sm:$0x3] %vm33_vm0, %v54_v11  }
  0x89   :  { %59 = vst.msk [vmem:[#allocation0 + $0x2] ss:$16 sm:$0xc] %vm33_vm0, %v54_v11  }
  0x8a   :  { %73 = vst.msk [vmem:[#allocation0 + $0x8] ss:$16 sm:$0x3] %vm33_vm0, %v70_v12  }
  0x8b   :  { %75 = vst.msk [vmem:[#allocation0 + $0x8] ss:$16 sm:$0xc] %vm33_vm0, %v70_v12  }
  0x8f   :  { %v102_v13 = vld [vmem:[#allocation0] sm:$0xf]  ;;  %v115_v14 = vld [vmem:[#allocation0 + $0x10] sm:$0xf]  ;;  %v94_v15 = vpop.permute.xlu0 %93  }
  0x90   :  { %v129_v16 = vld [vmem:[#allocation0 + $0x20] sm:$0xf]  ;;  %v143_v17 = vld [vmem:[#allocation0 + $0x30] sm:$0xf]  ;;  %v103_v18 = vpack.c.bf16 0.0, %v102_v13  ;;  %v116_v19 = vpack.c.bf16 0.0, %v115_v14 }
  0x91   :  { %v130_v20 = vpack.c.bf16 0.0, %v129_v16  ;;  %v144_v21 = vpack.c.bf16 0.0, %v143_v17  ;;  %97 = vst.msk [vmem:[#allocation0 + $0xb] ss:$16 sm:$0x3] %vm33_vm0, %v94_v15  }
  0x92   :  { %106 = vst [vmem:[%s237_s1] sm:$0x3] %v103_v18 }
  0x93   :  { %158 = vst [vmem:[%s237_s1 + $0x4] sm:$0x3] %v116_v19 }
  0x94   :  { %160 = vst [vmem:[%s237_s1 + $0x8] sm:$0x3] %v130_v20 }
  0x95   :  { %162 = vst [vmem:[%s237_s1 + $0xc] sm:$0x3] %v144_v21 }
  0x96   :  { %99 = vst.msk [vmem:[#allocation0 + $0xb] ss:$16 sm:$0xc] %vm33_vm0, %v94_v15  }
  0x98   :  { %v108_v22 = vld [vmem:[#allocation0 + $0x8] sm:$0xf]  ;;  %v122_v23 = vld [vmem:[#allocation0 + $0x18] sm:$0xf] }
  0x99   :  { %v109_v24 = vpack.c.bf16 0.0, %v108_v22  ;;  %v123_v25 = vpack.c.bf16 0.0, %v122_v23 }
  0x9b   :  { %157 = vst [vmem:[%s237_s1 + $0x2] sm:$0x3] %v109_v24 }
  0x9c   :  { %159 = vst [vmem:[%s237_s1 + $0x6] sm:$0x3] %v123_v25 }
  0x9d   :  { %v136_v26 = vld [vmem:[#allocation0 + $0x28] sm:$0xf]  ;;  %v150_v27 = vld [vmem:[#allocation0 + $0x38] sm:$0xf] }
  0x9e   :  { %v137_v28 = vpack.c.bf16 0.0, %v136_v26  ;;  %v151_v29 = vpack.c.bf16 0.0, %v150_v27 }
  0xa0   :  { %161 = vst [vmem:[%s237_s1 + $0xa] sm:$0x3] %v137_v28 }
  0xa1   :  { %163 = vst [vmem:[%s237_s1 + $0xe] sm:$0x3] %v151_v29 }

// kernel: decoder_forward.5
= control target key start
LH: loop header
LB: loop body
LE: loop exit
PB: predicated region body
PF: predicated region fallthrough
CT: control target
= control target key end

     0   :  { %vm31_vm0 = vcmask 130048   ;;  %s150_s1 = inlined_call_operand.vmem [shape: bf16[1,16,256], index: 1, kind: input, shape index: {}]   ;;  %s151_s0 = inlined_call_operand.vmem [shape: bf16[1,8,16], index: 0, kind: input, shape index: {}]   ;;  %s152_s2 = inlined_call_operand.vmem [shape: f32[1,1,256], index: 2, kind: input, shape index: {}]   ;;  %s153_s3 = inlined_call_operand.vmem [shape: f32[1,1,256], index: 3, kind: input, shape index: {}]   ;;  %s154_s4 = inlined_call_operand.vmem [shape: bf16[1,8,256], index: 4, kind: output, shape index: {}]  }
   0x1   :  { %v91_v0 = vld [vmem:[%s150_s1] sm:$0xf]  ;;  %v100_v1 = vld [vmem:[%s150_s1 + $0x4] sm:$0xf0]  ;;  %v99_v2 = vld [vmem:[%s150_s1 + $0x4] sm:$0xf] }
   0x2   :  { %v92_v3 = vor.u32 %v100_v1, %v91_v0  ;;  %v93_v4 = vld [vmem:[%s150_s1 + $0x8] sm:$0xf0]  ;;  %v18_v6 = vld [vmem:[%s151_s0] sm:$0xf] }
   0x3   :  { %v96_v5 = vor.u32 %v99_v2, %v93_v4  ;;  %v61_v7 = vld [vmem:[%s152_s2] sm:$0x3] }
   0x4   :  { %42 = vmatpush.bf16.msra.mxu0 %v92_v3  ;;  %v69_v8 = vld [vmem:[%s153_s3] sm:$0x3]  ;;  %v63_v9 = vperm.slane %v61_v7, 0  ;;  %v64_v10 = vperm.slane %v61_v7, 1 }
   0x5   :  { %55 = vmatpush.bf16.msra.mxu1 %v96_v5  ;;  %v71_v11 = vperm.slane %v69_v8, 0  ;;  %v72_v13 = vperm.slane %v69_v8, 1 }
   0x7   :  { %97 = vmatmul.msk.bf16.vlgmr.msra.gmra.mxu0 %vm31_vm0, %v18_v6 }
   0x8   :  { %98 = vmatmul.msk.bf16.vlgmr.msra.gmra.mxu1 %vm31_vm0, %v18_v6 }
  0x84   :  { %v44_v12 = vpop.f32.mrf.mxu0 }
  0x85   :  { %v67_v14 = vmul.f32 %v63_v9, %v44_v12  ;;  %v57_v15 = vpop.f32.mrf.mxu1 }
  0x86   :  { %v68_v16 = vmul.f32 %v64_v10, %v57_v15 }
  0x87   :  { %v75_v17 = vadd.f32 %v71_v11, %v67_v14 }
  0x88   :  { %v76_v18 = vadd.f32 %v72_v13, %v68_v16 }
  0x89   :  { %vm77_vm1 = vcmp.ge.f32.partialorder %v75_v17, 0.0  ;;  %v79_v19 = vmul.f32 0.2, %v75_v17 }
  0x8a   :  { %vm78_vm2 = vcmp.ge.f32.partialorder %v76_v18, 0.0  ;;  %v80_v20 = vmul.f32 0.2, %v76_v18 }
  0x8b   :  { %v81_v21 = vsel %vm77_vm1, %v75_v17, %v79_v19 }
  0x8c   :  { %v82_v22 = vsel %vm78_vm2, %v76_v18, %v80_v20  ;;  %v46_v23 = vpop.f32.mrf.mxu0 }
  0x8d   :  { %v83_v24 = vpack.c.bf16 %v82_v22, %v81_v21  ;;  %v59_v25 = vpop.f32.mrf.mxu1 }
  0x8f   :  { %84 = vst [vmem:[%s154_s4] sm:$0xff] %v83_v24 }

// kernel: decoder_forward.4
= control target key start
LH: loop header
LB: loop body
LE: loop exit
PB: predicated region body
PF: predicated region fallthrough
CT: control target
= control target key end

     0   :  { %vm24_vm0 = vcmask 1043456   ;;  %vm20_vm1 = vcmask 64512   ;;  %s103_s1 = inlined_call_operand.vmem [shape: bf16[1,8,128], index: 1, kind: input, shape index: {}]   ;;  %s104_s0 = inlined_call_operand.vmem [shape: bf16[1,8,8], index: 0, kind: input, shape index: {}]   ;;  %s105_s2 = inlined_call_operand.vmem [shape: f32[1,1,128], index: 2, kind: input, shape index: {}]   ;;  %s106_s3 = inlined_call_operand.vmem [shape: f32[1,1,128], index: 3, kind: input, shape index: {}]   ;;  %s107_s4 = inlined_call_operand.vmem [shape: bf16[1,8,128], index: 4, kind: output, shape index: {}]  }
   0x1   :  { %v19_v0 = vld [vmem:[%s103_s1] sm:$0xf] }
   0x2   :  { %v26_v1 = vsel %vm24_vm0, %v19_v0, 0  ;;  %v18_v2 = vld [vmem:[%s104_s0] sm:$0xf] }
   0x3   :  { %35 = vmatpush.bf16.msra.mxu0 %v26_v1  ;;  %v61_v3 = vld [vmem:[%s105_s2] ss:$0 sm:$0xff] }
   0x4   :  { %v62_v4 = vld [vmem:[%s106_s3] ss:$0 sm:$0xff] }
   0x6   :  { %60 = vmatmul.msk.bf16.vlgmr.msra.gmra.mxu0 %vm20_vm1, %v18_v2 }
  0x83   :  { %v37_v5 = vpop.f32.mrf.mxu0 }
  0x84   :  { %v45_v6 = vmul.f32 %v61_v3, %v37_v5 }
  0x86   :  { %v50_v7 = vadd.f32 %v62_v4, %v45_v6 }
  0x88   :  { %vm51_vm2 = vcmp.ge.f32.partialorder %v50_v7, 0.0  ;;  %v52_v8 = vmul.f32 0.2, %v50_v7 }
  0x8a   :  { %v53_v9 = vsel %vm51_vm2, %v50_v7, %v52_v8 }
  0x8b   :  { %v54_v10 = vpack.c.bf16 %v53_v9, %v53_v9  ;;  %v39_v11 = vpop.f32.mrf.mxu0 }
  0x8d   :  { %55 = vst [vmem:[%s107_s4] sm:$0xf] %v54_v10 }

// kernel: decoder_forward.6
= control target key start
LH: loop header
LB: loop body
LE: loop exit
PB: predicated region body
PF: predicated region fallthrough
CT: control target
= control target key end

     0   :  { %s649_s15 = smov 0   ;;  %s651_s16 = smov 0   ;;  %s701_s0 = inlined_call_operand.vmem [shape: bf16[4,32,64], index: 0, kind: input, shape index: {}]   ;;  %s702_s1 = inlined_call_operand.vmem [shape: bf16[4,64,128], index: 1, kind: input, shape index: {}]   ;;  %s703_s2 = inlined_call_operand.vmem [shape: f32[4,1,128], index: 2, kind: input, shape index: {}]   ;;  %s704_s3 = inlined_call_operand.vmem [shape: f32[4,1,128], index: 3, kind: input, shape index: {}]   ;;  %s705_s4 = inlined_call_operand.vmem [shape: bf16[4,32,128], index: 4, kind: output, shape index: {}]  }
   0x1   :  { %s653_s17 = smov 0  }
   0x2 LB: > { %s26_s18 = sadd.s32 1, %s618_s16  ;;  %p515_p0 = scmp.ge.s32.totalorder %s622_s17, 1  ;;  %s622_s17 = sphi %s653_s17, %s14_s17   ;;  %s618_s16 = sphi %s651_s16, %s707_s16   ;;  %s614_s15 = sphi %s649_s15, %s706_s15  }
   0x3   : > { %p28_p1 = scmp.ge.s32.totalorder %s26_s18, 4  ;;  %p209_p2 = scmp.lt.s32.totalorder %s622_s17, 5 }
   0x5   : > { %s709_s18 = smov (%p28_p1, %s26_s18), 0  ;;  %p210_p3 = pnand %p515_p0, %p209_p2 }
   0x6   : > { %p255_p4 = scmp.lt.s32.totalorder (!%p210_p3), %s614_s15, 3 }
   0x7   : > { %213 = sbr.rel (%p210_p3) target bundleno = 176 (0xb0), region = 36 }
   0xc   : > { %s711_s15 = smov (!%p255_p4, %s614_s15), 3  ;;  %vm332_vm0 = vcmask 523264  }
   0xd   : > { %s551_s19 = sshll.u32 %s711_s15, 5  ;;  %s271_s25 = scalar_lea.vmem %s703_s2, %s711_s15 }
   0xe   : > { %s268_s22 = scalar_lea.vmem %s702_s1, %s551_s19  ;;  %s274_s28 = scalar_lea.vmem %s704_s3, %s711_s15  ;;  %v598_v6 = vld [vmem:[%s271_s25] ss:$0 sm:$0xff] }
   0xf   : > { %v558_v0 = vld [vmem:[%s268_s22 + $0x18] sm:$0xff]  ;;  %v557_v1 = vld [vmem:[%s268_s22 + $0x10] sm:$0xff]  ;;  %v556_v2 = vld [vmem:[%s268_s22 + $0x8] sm:$0xff]  ;;  %s550_s29 = sshll.u32 %s711_s15, 4 }
  0x10   : > { %343 = vmatpush.bf16.msra.mxu0 %v558_v0  ;;  %570 = vmatpush.bf16.msra.mxu1 %v558_v0  ;;  %v555_v3 = vld [vmem:[%s268_s22] sm:$0xff]  ;;  %s262_s6 = scalar_lea.vmem %s701_s0, %s550_s29  ;;  %s283_s9 = scalar_lea.vmem %s705_s4, %s550_s29 }
  0x11   : > { %v553_v4 = vld [vmem:[%s262_s6] sm:$0xff]  ;;  %v554_v5 = vld [vmem:[%s262_s6 + $0x8] sm:$0xff] }
  0x12   : > { %v599_v10 = vld [vmem:[%s274_s28] ss:$0 sm:$0xff] }
  0x14   : > { %344 = vmatpush.bf16.msra.mxu0 %v557_v1  ;;  %571 = vmatpush.bf16.msra.mxu1 %v557_v1 }
  0x18   : > { %345 = vmatpush.bf16.msra.mxu0 %v556_v2  ;;  %572 = vmatpush.bf16.msra.mxu1 %v556_v2 }
  0x1c   : > { %346 = vmatpush.bf16.msra.mxu0 %v555_v3  ;;  %573 = vmatpush.bf16.msra.mxu1 %v555_v3 }
  0x1f   : > { %546 = vmatmul.msk.bf16.vlgmr.msra.gmra.mxu0 %vm332_vm0, %v553_v4  ;;  %547 = vmatmul.msk.bf16.vlgmr.msra.gmra.mxu1 %vm332_vm0, %v554_v5 }
  0x9c   : > { %v348_v7 = vpop.f32.mrf.mxu0  ;;  %v353_v8 = vpop.f32.mrf.mxu1 }
  0x9d   : > { %v362_v9 = vmul.f32 %v598_v6, %v348_v7  ;;  %v364_v11 = vmul.f32 %v598_v6, %v353_v8 }
  0x9f   : > { %v370_v12 = vadd.f32 %v599_v10, %v362_v9  ;;  %v372_v13 = vadd.f32 %v599_v10, %v364_v11 }
  0xa1   : > { %v378_v18 = vmul.f32 0.2, %v370_v12  ;;  %v380_v19 = vmul.f32 0.2, %v372_v13  ;;  %vm374_vm1 = vcmp.ge.f32.partialorder %v370_v12, 0.0  ;;  %vm376_vm2 = vcmp.ge.f32.partialorder %v372_v13, 0.0 }
  0xa3   : > { %v382_v24 = vsel %vm374_vm1, %v370_v12, %v378_v18  ;;  %v384_v25 = vsel %vm376_vm2, %v372_v13, %v380_v19 }
  0xa4   : > { %v350_v14 = vpop.f32.mrf.mxu0  ;;  %v355_v15 = vpop.f32.mrf.mxu1 }
  0xa5   : > { %v363_v16 = vmul.f32 %v598_v6, %v350_v14  ;;  %v365_v17 = vmul.f32 %v598_v6, %v355_v15 }
  0xa7   : > { %v371_v20 = vadd.f32 %v599_v10, %v363_v16  ;;  %v373_v21 = vadd.f32 %v599_v10, %v365_v17 }
  0xa9   : > { %vm375_vm3 = vcmp.ge.f32.partialorder %v371_v20, 0.0  ;;  %v379_v22 = vmul.f32 0.2, %v371_v20  ;;  %vm377_vm4 = vcmp.ge.f32.partialorder %v373_v21, 0.0  ;;  %v381_v23 = vmul.f32 0.2, %v373_v21 }
  0xab   : > { %v383_v26 = vsel %vm375_vm3, %v371_v20, %v379_v22  ;;  %v385_v27 = vsel %vm377_vm4, %v373_v21, %v381_v23 }
  0xac   : > { %v562_v28 = vpack.c.bf16 %v383_v26, %v382_v24  ;;  %v567_v29 = vpack.c.bf16 %v385_v27, %v384_v25 }
  0xae   : > { %563 = vst [vmem:[%s283_s9] sm:$0xff] %v562_v28  }
  0xaf   : > { %569 = vst [vmem:[%s283_s9 + $0x8] sm:$0xff] %v567_v29  }
  0xb0 PF: > { %s14_s17 = sadd.s32 1, %s622_s17   ;;  %s706_s15 = smov %s618_s16 }
  0xb1   : > { %p11_p5 = scmp.ge.s32.totalorder %s14_s17, 6   ;;  %s707_s16 = smov %s709_s18 }
  0xb3   :  { %13 = sbr.rel (!%p11_p5) target bundleno = 2 (0x2), region = 75 }

// kernel: decoder_forward.7
= control target key start
LH: loop header
LB: loop body
LE: loop exit
PB: predicated region body
PF: predicated region fallthrough
CT: control target
= control target key end

     0   :  { %s808_s15 = smov 0   ;;  %s810_s16 = smov 0   ;;  %s919_s0 = inlined_call_operand.vmem [shape: bf16[4,128,32], index: 0, kind: input, shape index: {}]   ;;  %s920_s1 = inlined_call_operand.vmem [shape: bf16[4,32,128], index: 1, kind: input, shape index: {}]   ;;  %s921_s2 = inlined_call_operand.vmem [shape: f32[4,1,128], index: 2, kind: input, shape index: {}]   ;;  %s922_s3 = inlined_call_operand.vmem [shape: f32[4,1,128], index: 3, kind: input, shape index: {}]   ;;  %s923_s4 = inlined_call_operand.vmem [shape: f32[4,128,128], index: 4, kind: output, shape index: {}]  }
   0x1   :  { %s812_s17 = smov 0  }
   0x2 LB: > { %s26_s18 = sadd.s32 1, %s777_s16  ;;  %p625_p0 = scmp.ge.s32.totalorder %s781_s17, 1  ;;  %s781_s17 = sphi %s812_s17, %s14_s17   ;;  %s777_s16 = sphi %s810_s16, %s925_s16   ;;  %s773_s15 = sphi %s808_s15, %s924_s15  }
   0x3   : > { %p28_p1 = scmp.ge.s32.totalorder %s26_s18, 4  ;;  %p209_p2 = scmp.lt.s32.totalorder %s781_s17, 5 }
   0x5   : > { %s927_s18 = smov (%p28_p1, %s26_s18), 0  ;;  %p210_p3 = pnand %p625_p0, %p209_p2 }
   0x6   : > { %p255_p4 = scmp.lt.s32.totalorder (!%p210_p3), %s773_s15, 3 }
   0x7   : > { %213 = sbr.rel (%p210_p3) target bundleno = 193 (0xc1), region = 36 }
   0xc   : > { %s929_s15 = smov (!%p255_p4, %s773_s15), 3  ;;  %vm358_vm0 = vcmask 261120  }
   0xd   : > { %s683_s19 = sshll.u32 %s929_s15, 4  ;;  %s682_s20 = sshll.u32 %s929_s15, 6 }
   0xe   : > { %s268_s23 = scalar_lea.vmem %s920_s1, %s683_s19  ;;  %s271_s26 = scalar_lea.vmem %s921_s2, %s929_s15 }
   0xf   : > { %v694_v0 = vld [vmem:[%s268_s23 + $0x8] sm:$0xff]  ;;  %s274_s29 = scalar_lea.vmem %s922_s3, %s929_s15  ;;  %s262_s6 = scalar_lea.vmem %s919_s0, %s682_s20  ;;  %v693_v1 = vld [vmem:[%s268_s23] sm:$0xff] }
  0x10   : > { %389 = vmatpush.bf16.msra.mxu0 %v694_v0  ;;  %695 = vmatpush.bf16.msra.mxu1 %v694_v0  ;;  %v685_v2 = vld [vmem:[%s262_s6] sm:$0xff]  ;;  %v687_v3 = vld [vmem:[%s262_s6 + $0x10] sm:$0xff]  ;;  %v686_v6 = vld [vmem:[%s262_s6 + $0x8] sm:$0xff]  ;;  %s684_s7 = sshll.u32 %s929_s15, 7 }
  0x11   : > { %696 = vmatpush.bf16.msra.mxu2 %v694_v0  ;;  %697 = vmatpush.bf16.msra.mxu3 %v694_v0  ;;  %v689_v4 = vld [vmem:[%s262_s6 + $0x20] sm:$0xff]  ;;  %v691_v5 = vld [vmem:[%s262_s6 + $0x30] sm:$0xff]  ;;  %v688_v7 = vld [vmem:[%s262_s6 + $0x18] sm:$0xff]  ;;  %s866_s10 = scalar_lea.vmem %s923_s4, %s684_s7 }
  0x12   : > { %v690_v8 = vld [vmem:[%s262_s6 + $0x28] sm:$0xff]  ;;  %v692_v9 = vld [vmem:[%s262_s6 + $0x38] sm:$0xff]  ;;  %v852_v10 = vld [vmem:[%s271_s26] ss:$0 sm:$0xff] }
  0x13   : > { %v854_v11 = vld [vmem:[%s274_s29] ss:$0 sm:$0xff] }
  0x14   : > { %390 = vmatpush.bf16.msra.mxu0 %v693_v1  ;;  %698 = vmatpush.bf16.msra.mxu1 %v693_v1 }
  0x15   : > { %699 = vmatpush.bf16.msra.mxu2 %v693_v1  ;;  %700 = vmatpush.bf16.msra.mxu3 %v693_v1 }
  0x17   : > { %672 = vmatmul.msk.bf16.vlgmr.msra.gmra.mxu0 %vm358_vm0, %v685_v2  ;;  %674 = vmatmul.msk.bf16.vlgmr.msra.gmra.mxu1 %vm358_vm0, %v687_v3 }
  0x18   : > { %676 = vmatmul.msk.bf16.vlgmr.msra.gmra.mxu2 %vm358_vm0, %v689_v4  ;;  %678 = vmatmul.msk.bf16.vlgmr.msra.gmra.mxu3 %vm358_vm0, %v691_v5 }
  0x27   : > { %673 = vmatmul.msk.bf16.gmra.mxu0 %vm358_vm0, %v686_v6  ;;  %675 = vmatmul.msk.bf16.gmra.mxu1 %vm358_vm0, %v688_v7 }
  0x28   : > { %677 = vmatmul.msk.bf16.gmra.mxu2 %vm358_vm0, %v690_v8  ;;  %679 = vmatmul.msk.bf16.gmra.mxu3 %vm358_vm0, %v692_v9 }
  0x94   : > { %v392_v12 = vpop.f32.mrf.mxu0  ;;  %v402_v13 = vpop.f32.mrf.mxu1 }
  0x95   : > { %v436_v14 = vmul.f32 %v852_v10, %v392_v12  ;;  %v440_v15 = vmul.f32 %v852_v10, %v402_v13 }
  0x97   : > { %v456_v16 = vadd.f32 %v854_v11, %v436_v14  ;;  %v460_v17 = vadd.f32 %v854_v11, %v440_v15 }
  0x99   : > { %727 = vtanh.f32 %v456_v16 }
  0x9a   : > { %729 = vtanh.f32 %v460_v17 }
  0x9b   : > { %v412_v18 = vpop.f32.mrf.mxu2  ;;  %v422_v19 = vpop.f32.mrf.mxu3 }
  0x9c   : > { %v444_v20 = vmul.f32 %v852_v10, %v412_v18  ;;  %v448_v21 = vmul.f32 %v852_v10, %v422_v19  ;;  %v394_v22 = vpop.f32.mrf.mxu0  ;;  %v404_v23 = vpop.f32.mrf.mxu1 }
  0x9d   : > { %v437_v24 = vmul.f32 %v852_v10, %v394_v22  ;;  %v441_v25 = vmul.f32 %v852_v10, %v404_v23 }
  0x9e   : > { %v464_v26 = vadd.f32 %v854_v11, %v444_v20  ;;  %v468_v27 = vadd.f32 %v854_v11, %v448_v21 }
  0x9f   : > { %v728_v28 = vpop.eup %727  ;;  %v457_v29 = vadd.f32 %v854_v11, %v437_v24  ;;  %v461_v30 = vadd.f32 %v854_v11, %v441_v25 }
  0xa0   : > { %v730_v31 = vpop.eup %729  ;;  %488 = vst [vmem:[%s866_s10] sm:$0xff] %v728_v28  ;;  %731 = vtanh.f32 %v464_v26 }
  0xa1   : > { %492 = vst [vmem:[%s866_s10 + $0x20] sm:$0xff] %v730_v31  ;;  %733 = vtanh.f32 %v468_v27 }
  0xa2   : > { %735 = vtanh.f32 %v457_v29 }
  0xa3   : > { %737 = vtanh.f32 %v461_v30  ;;  %v414_v32 = vpop.f32.mrf.mxu2  ;;  %v424_v33 = vpop.f32.mrf.mxu3 }
  0xa4   : > { %v445_v34 = vmul.f32 %v852_v10, %v414_v32  ;;  %v449_v35 = vmul.f32 %v852_v10, %v424_v33  ;;  %v397_v36 = vpop.f32.mrf.mxu0  ;;  %v407_v37 = vpop.f32.mrf.mxu1 }
  0xa5   : > { %v438_v38 = vmul.f32 %v852_v10, %v397_v36  ;;  %v442_v39 = vmul.f32 %v852_v10, %v407_v37 }
  0xa6   : > { %v732_v40 = vpop.eup %731  ;;  %v465_v41 = vadd.f32 %v854_v11, %v445_v34  ;;  %v469_v42 = vadd.f32 %v854_v11, %v449_v35 }
  0xa7   : > { %v734_v43 = vpop.eup %733  ;;  %496 = vst [vmem:[%s866_s10 + $0x40] sm:$0xff] %v732_v40  ;;  %v458_v44 = vadd.f32 %v854_v11, %v438_v38  ;;  %v462_v45 = vadd.f32 %v854_v11, %v442_v39 }
  0xa8   : > { %v736_v46 = vpop.eup %735  ;;  %500 = vst [vmem:[%s866_s10 + $0x60] sm:$0xff] %v734_v43  ;;  %739 = vtanh.f32 %v465_v41 }
  0xa9   : > { %v738_v47 = vpop.eup %737  ;;  %489 = vst [vmem:[%s866_s10 + $0x8] sm:$0xff] %v736_v46  ;;  %741 = vtanh.f32 %v469_v42 }
  0xaa   : > { %493 = vst [vmem:[%s866_s10 + $0x28] sm:$0xff] %v738_v47  ;;  %743 = vtanh.f32 %v458_v44 }
  0xab   : > { %745 = vtanh.f32 %v462_v45  ;;  %v417_v48 = vpop.f32.mrf.mxu2  ;;  %v427_v49 = vpop.f32.mrf.mxu3 }
  0xac   : > { %v446_v50 = vmul.f32 %v852_v10, %v417_v48  ;;  %v450_v51 = vmul.f32 %v852_v10, %v427_v49  ;;  %v399_v52 = vpop.f32.mrf.mxu0  ;;  %v409_v53 = vpop.f32.mrf.mxu1 }
  0xad   : > { %v439_v54 = vmul.f32 %v852_v10, %v399_v52  ;;  %v443_v55 = vmul.f32 %v852_v10, %v409_v53 }
  0xae   : > { %v740_v56 = vpop.eup %739  ;;  %v466_v57 = vadd.f32 %v854_v11, %v446_v50  ;;  %v470_v58 = vadd.f32 %v854_v11, %v450_v51 }
  0xaf   : > { %v742_v59 = vpop.eup %741  ;;  %497 = vst [vmem:[%s866_s10 + $0x48] sm:$0xff] %v740_v56  ;;  %v459_v60 = vadd.f32 %v854_v11, %v439_v54  ;;  %v463_v61 = vadd.f32 %v854_v11, %v443_v55 }
  0xb0   : > { %v744_v62 = vpop.eup %743  ;;  %501 = vst [vmem:[%s866_s10 + $0x68] sm:$0xff] %v742_v59  ;;  %747 = vtanh.f32 %v466_v57 }
  0xb1   : > { %v746_v63 = vpop.eup %745  ;;  %490 = vst [vmem:[%s866_s10 + $0x10] sm:$0xff] %v744_v62  ;;  %749 = vtanh.f32 %v470_v58 }
  0xb2   : > { %494 = vst [vmem:[%s866_s10 + $0x30] sm:$0xff] %v746_v63  ;;  %751 = vtanh.f32 %v459_v60 }
  0xb3   : > { %753 = vtanh.f32 %v463_v61  ;;  %v419_v0 = vpop.f32.mrf.mxu2  ;;  %v429_v1 = vpop.f32.mrf.mxu3 }
  0xb4   : > { %v447_v2 = vmul.f32 %v852_v10, %v419_v0  ;;  %v451_v3 = vmul.f32 %v852_v10, %v429_v1 }
  0xb6   : > { %v748_v4 = vpop.eup %747  ;;  %v467_v5 = vadd.f32 %v854_v11, %v447_v2  ;;  %v471_v6 = vadd.f32 %v854_v11, %v451_v3 }
  0xb7   : > { %v750_v7 = vpop.eup %749  ;;  %498 = vst [vmem:[%s866_s10 + $0x50] sm:$0xff] %v748_v4 }
  0xb8   : > { %v752_v8 = vpop.eup %751  ;;  %502 = vst [vmem:[%s866_s10 + $0x70] sm:$0xff] %v750_v7  ;;  %755 = vtanh.f32 %v467_v5 }
  0xb9   : > { %v754_v9 = vpop.eup %753  ;;  %491 = vst [vmem:[%s866_s10 + $0x18] sm:$0xff] %v752_v8  ;;  %757 = vtanh.f32 %v471_v6 }
  0xba   : > { %495 = vst [vmem:[%s866_s10 + $0x38] sm:$0xff] %v754_v9 }
  0xbe   : > { %v756_v12 = vpop.eup %755 }
  0xbf   : > { %v758_v13 = vpop.eup %757  ;;  %499 = vst [vmem:[%s866_s10 + $0x58] sm:$0xff] %v756_v12 }
  0xc0   : > { %503 = vst [vmem:[%s866_s10 + $0x78] sm:$0xff] %v758_v13 }
  0xc1 PF: > { %s14_s17 = sadd.s32 1, %s781_s17   ;;  %s924_s15 = smov %s777_s16 }
  0xc2   : > { %p11_p5 = scmp.ge.s32.totalorder %s14_s17, 6   ;;  %s925_s16 = smov %s927_s18 }
  0xc4   :  { %13 = sbr.rel (!%p11_p5) target bundleno = 2 (0x2), region = 75 }

</bundles_post_ra>
